<compile_context>
chip_gen: v7x
topology: tpu7x:2x2x1
jax: 0.10.0
libtpu: 0.0.40
codegen_flags: <defaults>
</compile_context>

<pallas_src>
import jax
import jax.numpy as jnp
from jax.experimental import pallas as pl
from jax.experimental.pallas import tpu as pltpu

# ---------------- small synthetic BERT config (stand-in for bert-base-uncased) ----
VOCAB = 50
HIDDEN = 32
HEADS = 2
HEAD_DIM = HIDDEN // HEADS
INTERMEDIATE = 64
LAYERS = 2
MAX_POS = 16
TYPE_VOCAB = 2
NUM_CLASSES = 2
LN_EPS = 1e-12
ATTN_SCALE = 1.0 / float(HEAD_DIM) ** 0.5


# ---------------- in-kernel helpers ------------------------------------------------


def _ln(x, g, b, eps=LN_EPS):
    mean = jnp.mean(x, axis=-1, keepdims=True)
    var = jnp.mean(jnp.square(x - mean), axis=-1, keepdims=True)
    return (x - mean) * jax.lax.rsqrt(var + eps) * g + b


# ---------------- Pallas kernels ----------------------------------------------------


def _ln_kernel(x_ref, g_ref, b_ref, o_ref):
    o_ref[...] = _ln(x_ref[...], g_ref[...], b_ref[...]).astype(o_ref.dtype)


def layernorm(x, gamma, beta):
    """LayerNorm over the last axis of x:(B,S,H).  No zero-residual DMA."""
    B, S, H = x.shape
    return pl.pallas_call(
        _ln_kernel,
        out_shape=jax.ShapeDtypeStruct((B, S, H), jnp.float32),
        grid=(1,),
        in_specs=[
            pl.BlockSpec((B, S, H), lambda i: (0, 0, 0)),
            pl.BlockSpec((1, H), lambda i: (0, 0)),
            pl.BlockSpec((1, H), lambda i: (0, 0)),
        ],
        out_specs=pl.BlockSpec((B, S, H), lambda i: (0, 0, 0)),
    )(x, gamma.reshape(1, H), beta.reshape(1, H))


def _encoder_layer_kernel(
    x_ref, m_ref,
    wqkv_ref, bqkv_ref, wo_ref, bo_ref, ln1g_ref, ln1b_ref,
    w1_ref, b1_ref, w2_ref, b2_ref, ln2g_ref, ln2b_ref,
    o_ref,
):
    """One full transformer encoder layer for one batch element, fully in VMEM."""
    x = x_ref[0]        # (S, H)
    mask = m_ref[0]     # (1, S) additive mask (0 / -1e4), broadcast over query rows
    H, NH, HD = HIDDEN, HEADS, HEAD_DIM

    # Fused QKV projection: one MXU pass instead of three pallas_calls.
    qkv = jnp.dot(x, wqkv_ref[...], preferred_element_type=jnp.float32) + bqkv_ref[...]

    # Per-head attention.  Heads are contiguous lane slices of the QKV result, so the
    # split/merge never touches HBM; merging is folded into Wo by accumulating
    # ctx_h @ Wo[h*HD:(h+1)*HD, :]  (mathematically identical to concat @ Wo).
    acc = None
    for h in range(NH):
        q = qkv[:, h * HD:(h + 1) * HD]
        k = qkv[:, H + h * HD:H + (h + 1) * HD]
        v = qkv[:, 2 * H + h * HD:2 * H + (h + 1) * HD]
        s = jax.lax.dot_general(
            q, k, (((1,), (1,)), ((), ())), preferred_element_type=jnp.float32
        )                                            # (S, S) = q @ k^T
        s = s * ATTN_SCALE + mask
        s = s - jnp.max(s, axis=-1, keepdims=True)
        p = jnp.exp(s)
        p = p * pl.reciprocal(jnp.sum(p, axis=-1, keepdims=True), approx=True)
        ctx = jnp.dot(p, v, preferred_element_type=jnp.float32)          # (S, HD)
        part = jnp.dot(ctx, wo_ref[h * HD:(h + 1) * HD, :],
                       preferred_element_type=jnp.float32)               # (S, H)
        acc = part if acc is None else acc + part
    attn = acc + bo_ref[...]

    # Residual + LayerNorm epilogue (free VPU/XLU work on the resident tile).
    h1 = _ln(attn + x, ln1g_ref[...], ln1b_ref[...])

    # Feed-forward block fused in as well.
    ff = jnp.dot(h1, w1_ref[...], preferred_element_type=jnp.float32) + b1_ref[...]
    # TODO(synk): HF BERT uses exact (erf) GELU; tanh approximation used here for
    # robust Mosaic lowering of the transcendental.
    ff = jax.nn.gelu(ff, approximate=True)
    ff = jnp.dot(ff, w2_ref[...], preferred_element_type=jnp.float32) + b2_ref[...]

    o_ref[0] = _ln(ff + h1, ln2g_ref[...], ln2b_ref[...]).astype(o_ref.dtype)


def encoder_layer(x, add_mask, lyr):
    """x:(B,S,H), add_mask:(B,1,S) additive.  One fused pallas_call per layer."""
    B, S, H = x.shape
    I = lyr["w1"].shape[1]

    def wspec(shape):
        return pl.BlockSpec(shape, lambda b: (0, 0))   # weights: resident, DMA'd once

    return pl.pallas_call(
        _encoder_layer_kernel,
        out_shape=jax.ShapeDtypeStruct((B, S, H), jnp.float32),
        grid=(B,),
        in_specs=[
            pl.BlockSpec((1, S, H), lambda b: (b, 0, 0)),
            pl.BlockSpec((1, 1, S), lambda b: (b, 0, 0)),
            wspec((H, 3 * H)), wspec((1, 3 * H)),
            wspec((H, H)), wspec((1, H)),
            wspec((1, H)), wspec((1, H)),
            wspec((H, I)), wspec((1, I)),
            wspec((I, H)), wspec((1, H)),
            wspec((1, H)), wspec((1, H)),
        ],
        out_specs=pl.BlockSpec((1, S, H), lambda b: (b, 0, 0)),
        compiler_params=pltpu.CompilerParams(dimension_semantics=("parallel",)),
    )(
        x, add_mask,
        lyr["wqkv"], lyr["bqkv"].reshape(1, 3 * H),
        lyr["wo"], lyr["bo"].reshape(1, H),
        lyr["ln1_g"].reshape(1, H), lyr["ln1_b"].reshape(1, H),
        lyr["w1"], lyr["b1"].reshape(1, I),
        lyr["w2"], lyr["b2"].reshape(1, H),
        lyr["ln2_g"].reshape(1, H), lyr["ln2_b"].reshape(1, H),
    )


def _pool_clf_kernel(cls_ref, pw_ref, pb_ref, cw_ref, cb_ref, o_ref):
    pooled = jnp.tanh(
        jnp.dot(cls_ref[...], pw_ref[...], preferred_element_type=jnp.float32)
        + pb_ref[...]
    )
    # post_dropout: identity at inference (eval-mode nn.Dropout).
    o_ref[...] = (
        jnp.dot(pooled, cw_ref[...], preferred_element_type=jnp.float32) + cb_ref[...]
    ).astype(o_ref.dtype)


def pooler_classifier(cls, pool_w, pool_b, clf_w, clf_b):
    """logits = (tanh(cls @ Wp + bp)) @ Wc + bc, fused into one tiny kernel."""
    B, H = cls.shape
    C = clf_w.shape[1]
    return pl.pallas_call(
        _pool_clf_kernel,
        out_shape=jax.ShapeDtypeStruct((B, C), jnp.float32),
        grid=(1,),
        in_specs=[
            pl.BlockSpec((B, H), lambda i: (0, 0)),
            pl.BlockSpec((H, H), lambda i: (0, 0)),
            pl.BlockSpec((1, H), lambda i: (0, 0)),
            pl.BlockSpec((H, C), lambda i: (0, 0)),
            pl.BlockSpec((1, C), lambda i: (0, 0)),
        ],
        out_specs=pl.BlockSpec((B, C), lambda i: (0, 0)),
    )(cls, pool_w, pool_b.reshape(1, H), clf_w, clf_b.reshape(1, C))


# ---------------- parameters (deterministic, synthetic) ---------------------------


def init_params(key):
    def normal(k, shape):
        return 0.02 * jax.random.normal(k, shape, dtype=jnp.float32)

    keys = jax.random.split(key, 6 + LAYERS)
    params = {
        "word_emb": normal(keys[0], (VOCAB, HIDDEN)),
        "pos_emb": normal(keys[1], (MAX_POS, HIDDEN)),
        "type_emb": normal(keys[2], (TYPE_VOCAB, HIDDEN)),
        "emb_ln_g": jnp.ones((HIDDEN,), jnp.float32),
        "emb_ln_b": jnp.zeros((HIDDEN,), jnp.float32),
        "pool_w": normal(keys[3], (HIDDEN, HIDDEN)),
        "pool_b": jnp.zeros((HIDDEN,), jnp.float32),
        "clf_w": normal(keys[4], (HIDDEN, NUM_CLASSES)),
        "clf_b": jnp.zeros((NUM_CLASSES,), jnp.float32),
        "layers": [],
    }
    for l in range(LAYERS):
        lk = jax.random.split(keys[6 + l], 6)
        # QKV weights stored pre-fused as (H, 3H) / (3H,)  == concat(Wq, Wk, Wv).
        wqkv = jnp.concatenate(
            [normal(lk[0], (HIDDEN, HIDDEN)),
             normal(lk[1], (HIDDEN, HIDDEN)),
             normal(lk[2], (HIDDEN, HIDDEN))], axis=1)
        params["layers"].append(
            {
                "wqkv": wqkv, "bqkv": jnp.zeros((3 * HIDDEN,), jnp.float32),
                "wo": normal(lk[3], (HIDDEN, HIDDEN)), "bo": jnp.zeros((HIDDEN,), jnp.float32),
                "ln1_g": jnp.ones((HIDDEN,), jnp.float32), "ln1_b": jnp.zeros((HIDDEN,), jnp.float32),
                "w1": normal(lk[4], (HIDDEN, INTERMEDIATE)), "b1": jnp.zeros((INTERMEDIATE,), jnp.float32),
                "w2": normal(lk[5], (INTERMEDIATE, HIDDEN)), "b2": jnp.zeros((HIDDEN,), jnp.float32),
                "ln2_g": jnp.ones((HIDDEN,), jnp.float32), "ln2_b": jnp.zeros((HIDDEN,), jnp.float32),
            }
        )
    return params


# ---------------- forward pass (mirrors Bert4Clf.forward) --------------------------


def bert4clf_forward(params, input_ids, attention_masks, labels=None):
    B, S = input_ids.shape

    # --- BERT embeddings (gathers are glue; LayerNorm is a Pallas kernel) ---
    tok = jnp.take(params["word_emb"], input_ids, axis=0)          # (B,S,H)
    pos = params["pos_emb"][:S][None, :, :]                        # (1,S,H)
    typ = params["type_emb"][0][None, None, :]                     # token_type_ids = 0
    emb = (tok + pos + typ).astype(jnp.float32)
    h = layernorm(emb, params["emb_ln_g"], params["emb_ln_b"])     # (B,S,H)

    # --- HF-style additive attention mask, consumed inside the fused layer kernel ---
    add_mask = ((1.0 - attention_masks.astype(jnp.float32)) * -1e4).reshape(B, 1, S)

    # --- transformer encoder: one fused pallas_call per layer ---
    for lyr in params["layers"]:
        h = encoder_layer(h, add_mask, lyr)

    # --- pooler (tanh on [CLS]) + dropout(identity at eval) + classifier, fused ---
    cls = h[:, 0, :]                                               # (B,H)
    logits = pooler_classifier(
        cls, params["pool_w"], params["pool_b"], params["clf_w"], params["clf_b"]
    )                                                              # (B,2)

    outputs = (logits,)
    if labels is not None:
        logp = jax.nn.log_softmax(logits, axis=-1)
        nll = -jnp.take_along_axis(logp, labels.reshape(-1, 1), axis=1)
        outputs = outputs + (jnp.mean(nll),)
    return outputs


# ---------------- demo -------------------------------------------------------------

if __name__ == "__main__":
    key = jax.random.PRNGKey(0)
    pkey, ikey = jax.random.split(key)
    params = init_params(pkey)

    B, S = 2, 8
    input_ids = jax.random.randint(ikey, (B, S), 0, VOCAB, dtype=jnp.int32)
    attention_masks = jnp.ones((B, S), dtype=jnp.int32).at[1, 6:].set(0)  # pad tail of sample 1
    labels = jnp.array([0, 1], dtype=jnp.int32)

    fwd = jax.jit(bert4clf_forward)
    logits, loss = fwd(params, input_ids, attention_masks, labels)
    jax.block_until_ready((logits, loss))

    assert logits.shape == (B, NUM_CLASSES)
    assert loss.shape == ()
    print("KERNEL_OK")
</pallas_src>

<mosaic_0001>
module attributes {stable_mosaic.version = 11 : i64} {
  func.func @_ln_kernel(%arg0: i32, %arg1: memref<2x8x32xf32, #tpu.memory_space<vmem>>, %arg2: memref<1x32xf32, #tpu.memory_space<vmem>>, %arg3: memref<1x32xf32, #tpu.memory_space<vmem>>, %arg4: memref<2x8x32xf32, #tpu.memory_space<vmem>>) attributes {dimension_semantics = [#tpu.dimension_semantics<arbitrary>], iteration_bounds = array<i64: 1>, scalar_prefetch = 0 : i64, scratch_operands = 0 : i64, tpu.core_type = #tpu.core_type<tc>, window_params = [{pipeline_mode = #tpu.pipeline_mode<synchronous>, transform_indices = @transform_0, window_bounds = array<i64: 2, 8, 32>}, {pipeline_mode = #tpu.pipeline_mode<synchronous>, transform_indices = @transform_1, window_bounds = array<i64: 1, 32>}, {pipeline_mode = #tpu.pipeline_mode<synchronous>, transform_indices = @transform_2, window_bounds = array<i64: 1, 32>}, {pipeline_mode = #tpu.pipeline_mode<synchronous>, transform_indices = @transform_3, window_bounds = array<i64: 2, 8, 32>}]} {
    %c0 = arith.constant 0 : index
    %c0_0 = arith.constant 0 : index
    %c0_1 = arith.constant 0 : index
    %0 = vector.load %arg1[%c0, %c0_0, %c0_1] : memref<2x8x32xf32, #tpu.memory_space<vmem>>, vector<2x8x32xf32>
    %c0_2 = arith.constant 0 : index
    %c0_3 = arith.constant 0 : index
    %1 = vector.load %arg2[%c0_2, %c0_3] : memref<1x32xf32, #tpu.memory_space<vmem>>, vector<1x32xf32>
    %c0_4 = arith.constant 0 : index
    %c0_5 = arith.constant 0 : index
    %2 = vector.load %arg3[%c0_4, %c0_5] : memref<1x32xf32, #tpu.memory_space<vmem>>, vector<1x32xf32>
    %cst = arith.constant dense<0.000000e+00> : vector<2x8xf32>
    %3 = vector.multi_reduction <add>, %0, %cst [2] : vector<2x8x32xf32> to vector<2x8xf32>
    %4 = vector.shape_cast %3 : vector<2x8xf32> to vector<2x8x1xf32>
    %cst_6 = arith.constant 3.200000e+01 : f32
    %5 = vector.broadcast %cst_6 : f32 to vector<2x8x1xf32>
    %6 = arith.divf %4, %5 : vector<2x8x1xf32>
    %7 = vector.broadcast %6 : vector<2x8x1xf32> to vector<2x8x32xf32>
    %8 = arith.subf %0, %7 : vector<2x8x32xf32>
    %9 = arith.mulf %8, %8 : vector<2x8x32xf32>
    %cst_7 = arith.constant dense<0.000000e+00> : vector<2x8xf32>
    %10 = vector.multi_reduction <add>, %9, %cst_7 [2] : vector<2x8x32xf32> to vector<2x8xf32>
    %11 = vector.shape_cast %10 : vector<2x8xf32> to vector<2x8x1xf32>
    %cst_8 = arith.constant 3.200000e+01 : f32
    %12 = vector.broadcast %cst_8 : f32 to vector<2x8x1xf32>
    %13 = arith.divf %11, %12 : vector<2x8x1xf32>
    %14 = vector.broadcast %6 : vector<2x8x1xf32> to vector<2x8x32xf32>
    %15 = arith.subf %0, %14 : vector<2x8x32xf32>
    %cst_9 = arith.constant 9.99999996E-13 : f32
    %16 = vector.broadcast %cst_9 : f32 to vector<2x8x1xf32>
    %17 = arith.addf %13, %16 : vector<2x8x1xf32>
    %18 = math.rsqrt %17 : vector<2x8x1xf32>
    %19 = vector.broadcast %18 : vector<2x8x1xf32> to vector<2x8x32xf32>
    %20 = arith.mulf %15, %19 : vector<2x8x32xf32>
    %21 = vector.shape_cast %1 : vector<1x32xf32> to vector<1x1x32xf32>
    %22 = vector.broadcast %21 : vector<1x1x32xf32> to vector<2x8x32xf32>
    %23 = arith.mulf %20, %22 : vector<2x8x32xf32>
    %24 = vector.shape_cast %2 : vector<1x32xf32> to vector<1x1x32xf32>
    %25 = vector.broadcast %24 : vector<1x1x32xf32> to vector<2x8x32xf32>
    %26 = arith.addf %23, %25 : vector<2x8x32xf32>
    %c0_10 = arith.constant 0 : index
    %c0_11 = arith.constant 0 : index
    %c0_12 = arith.constant 0 : index
    %27 = vector.load %arg4[%c0_10, %c0_11, %c0_12] : memref<2x8x32xf32, #tpu.memory_space<vmem>>, vector<2x8x32xf32>
    tpu.vector_store %arg4[%c0_10, %c0_11, %c0_12], %26 {strides = array<i32>} : memref<2x8x32xf32, #tpu.memory_space<vmem>>, vector<2x8x32xf32>,
    return
  }
  func.func @transform_0(%arg0: i32) -> (i32, i32, i32) {
    %c0_i32 = arith.constant 0 : i32
    %c0_i32_0 = arith.constant 0 : i32
    %c0_i32_1 = arith.constant 0 : i32
    %c0_i32_2 = arith.constant 0 : i32
    return %c0_i32, %c0_i32_0, %c0_i32_1 : i32, i32, i32
  }
  func.func @transform_1(%arg0: i32) -> (i32, i32) {
    %c0_i32 = arith.constant 0 : i32
    %c0_i32_0 = arith.constant 0 : i32
    %c0_i32_1 = arith.constant 0 : i32
    return %c0_i32, %c0_i32_0 : i32, i32
  }
  func.func @transform_2(%arg0: i32) -> (i32, i32) {
    %c0_i32 = arith.constant 0 : i32
    %c0_i32_0 = arith.constant 0 : i32
    %c0_i32_1 = arith.constant 0 : i32
    return %c0_i32, %c0_i32_0 : i32, i32
  }
  func.func @transform_3(%arg0: i32) -> (i32, i32, i32) {
    %c0_i32 = arith.constant 0 : i32
    %c0_i32_0 = arith.constant 0 : i32
    %c0_i32_1 = arith.constant 0 : i32
    %c0_i32_2 = arith.constant 0 : i32
    return %c0_i32, %c0_i32_0, %c0_i32_1 : i32, i32, i32
  }
}

module attributes {stable_mosaic.version = 11 : i64} {
  func.func @_encoder_layer_kernel(%arg0: i32, %arg1: memref<1x8x32xf32, #tpu.memory_space<vmem>>, %arg2: memref<1x1x8xf32, #tpu.memory_space<vmem>>, %arg3: memref<32x96xf32, #tpu.memory_space<vmem>>, %arg4: memref<1x96xf32, #tpu.memory_space<vmem>>, %arg5: memref<32x32xf32, #tpu.memory_space<vmem>>, %arg6: memref<1x32xf32, #tpu.memory_space<vmem>>, %arg7: memref<1x32xf32, #tpu.memory_space<vmem>>, %arg8: memref<1x32xf32, #tpu.memory_space<vmem>>, %arg9: memref<32x64xf32, #tpu.memory_space<vmem>>, %arg10: memref<1x64xf32, #tpu.memory_space<vmem>>, %arg11: memref<64x32xf32, #tpu.memory_space<vmem>>, %arg12: memref<1x32xf32, #tpu.memory_space<vmem>>, %arg13: memref<1x32xf32, #tpu.memory_space<vmem>>, %arg14: memref<1x32xf32, #tpu.memory_space<vmem>>, %arg15: memref<1x8x32xf32, #tpu.memory_space<vmem>>) attributes {dimension_semantics = [#tpu.dimension_semantics<parallel>], iteration_bounds = array<i64: 2>, scalar_prefetch = 0 : i64, scratch_operands = 0 : i64, tpu.core_type = #tpu.core_type<tc>, window_params = [{transform_indices = @transform_0, window_bounds = array<i64: 1, 8, 32>}, {transform_indices = @transform_1, window_bounds = array<i64: 1, 1, 8>}, {pipeline_mode = #tpu.pipeline_mode<synchronous>, transform_indices = @transform_2, window_bounds = array<i64: 32, 96>}, {pipeline_mode = #tpu.pipeline_mode<synchronous>, transform_indices = @transform_3, window_bounds = array<i64: 1, 96>}, {pipeline_mode = #tpu.pipeline_mode<synchronous>, transform_indices = @transform_4, window_bounds = array<i64: 32, 32>}, {pipeline_mode = #tpu.pipeline_mode<synchronous>, transform_indices = @transform_5, window_bounds = array<i64: 1, 32>}, {pipeline_mode = #tpu.pipeline_mode<synchronous>, transform_indices = @transform_6, window_bounds = array<i64: 1, 32>}, {pipeline_mode = #tpu.pipeline_mode<synchronous>, transform_indices = @transform_7, window_bounds = array<i64: 1, 32>}, {pipeline_mode = #tpu.pipeline_mode<synchronous>, transform_indices = @transform_8, window_bounds = array<i64: 32, 64>}, {pipeline_mode = #tpu.pipeline_mode<synchronous>, transform_indices = @transform_9, window_bounds = array<i64: 1, 64>}, {pipeline_mode = #tpu.pipeline_mode<synchronous>, transform_indices = @transform_10, window_bounds = array<i64: 64, 32>}, {pipeline_mode = #tpu.pipeline_mode<synchronous>, transform_indices = @transform_11, window_bounds = array<i64: 1, 32>}, {pipeline_mode = #tpu.pipeline_mode<synchronous>, transform_indices = @transform_12, window_bounds = array<i64: 1, 32>}, {pipeline_mode = #tpu.pipeline_mode<synchronous>, transform_indices = @transform_13, window_bounds = array<i64: 1, 32>}, {transform_indices = @transform_14, window_bounds = array<i64: 1, 8, 32>}]} {
    %c0 = arith.constant 0 : index
    %c0_0 = arith.constant 0 : index
    %c0_1 = arith.constant 0 : index
    %0 = vector.load %arg1[%c0, %c0_0, %c0_1] : memref<1x8x32xf32, #tpu.memory_space<vmem>>, vector<1x8x32xf32>
    %1 = vector.shape_cast %0 : vector<1x8x32xf32> to vector<8x32xf32>
    %c0_2 = arith.constant 0 : index
    %c0_3 = arith.constant 0 : index
    %c0_4 = arith.constant 0 : index
    %2 = vector.load %arg2[%c0_2, %c0_3, %c0_4] : memref<1x1x8xf32, #tpu.memory_space<vmem>>, vector<1x1x8xf32>
    %3 = vector.shape_cast %2 : vector<1x1x8xf32> to vector<1x8xf32>
    %c0_5 = arith.constant 0 : index
    %c0_6 = arith.constant 0 : index
    %4 = vector.load %arg3[%c0_5, %c0_6] : memref<32x96xf32, #tpu.memory_space<vmem>>, vector<32x96xf32>
    %cst = arith.constant dense<0.000000e+00> : vector<8x96xf32>
    %5 = tpu.matmul %1, %4, %cst {dimension_numbers = #tpu.dot_dimension_numbers<[1], [0], [0], [1], [0, 0, 1, 1], [], []>} : vector<8x32xf32>, vector<32x96xf32>, vector<8x96xf32> -> vector<8x96xf32>
    %c0_7 = arith.constant 0 : index
    %c0_8 = arith.constant 0 : index
    %6 = vector.load %arg4[%c0_7, %c0_8] : memref<1x96xf32, #tpu.memory_space<vmem>>, vector<1x96xf32>
    %7 = vector.broadcast %6 : vector<1x96xf32> to vector<8x96xf32>
    %8 = arith.addf %5, %7 : vector<8x96xf32>
    %9 = vector.extract_strided_slice %8 {offsets = [0, 0], sizes = [8, 16], strides = [1, 1]} : vector<8x96xf32> to vector<8x16xf32>
    %10 = vector.extract_strided_slice %8 {offsets = [0, 32], sizes = [8, 16], strides = [1, 1]} : vector<8x96xf32> to vector<8x16xf32>
    %11 = vector.extract_strided_slice %8 {offsets = [0, 64], sizes = [8, 16], strides = [1, 1]} : vector<8x96xf32> to vector<8x16xf32>
    %cst_9 = arith.constant dense<0.000000e+00> : vector<8x8xf32>
    %12 = tpu.matmul %9, %10, %cst_9 {dimension_numbers = #tpu.dot_dimension_numbers<[1], [1], [0], [0], [0, 0, 1, 0], [], []>} : vector<8x16xf32>, vector<8x16xf32>, vector<8x8xf32> -> vector<8x8xf32>
    %cst_10 = arith.constant 2.500000e-01 : f32
    %13 = vector.broadcast %cst_10 : f32 to vector<8x8xf32>
    %14 = arith.mulf %12, %13 : vector<8x8xf32>
    %15 = vector.broadcast %3 : vector<1x8xf32> to vector<8x8xf32>
    %16 = arith.addf %14, %15 : vector<8x8xf32>
    %cst_11 = arith.constant dense<0xFF800000> : vector<8xf32>
    %17 = vector.multi_reduction <maximumf>, %16, %cst_11 [1] : vector<8x8xf32> to vector<8xf32>
    %18 = vector.shape_cast %17 : vector<8xf32> to vector<8x1xf32>
    %19 = vector.broadcast %18 : vector<8x1xf32> to vector<8x8xf32>
    %20 = arith.subf %16, %19 : vector<8x8xf32>
    %21 = math.exp %20 : vector<8x8xf32>
    %cst_12 = arith.constant dense<0.000000e+00> : vector<8xf32>
    %22 = vector.multi_reduction <add>, %21, %cst_12 [1] : vector<8x8xf32> to vector<8xf32>
    %23 = vector.shape_cast %22 : vector<8xf32> to vector<8x1xf32>
    %24 = tpu.reciprocal %23 {approx = true} : vector<8x1xf32> -> vector<8x1xf32>
    %25 = vector.broadcast %24 : vector<8x1xf32> to vector<8x8xf32>
    %26 = arith.mulf %21, %25 : vector<8x8xf32>
    %cst_13 = arith.constant dense<0.000000e+00> : vector<8x16xf32>
    %27 = tpu.matmul %26, %11, %cst_13 {dimension_numbers = #tpu.dot_dimension_numbers<[1], [0], [0], [1], [0, 0, 1, 1], [], []>} : vector<8x8xf32>, vector<8x16xf32>, vector<8x16xf32> -> vector<8x16xf32>
    %c0_14 = arith.constant 0 : index
    %c0_15 = arith.constant 0 : index
    %28 = vector.load %arg5[%c0_14, %c0_15] : memref<32x32xf32, #tpu.memory_space<vmem>>, vector<16x32xf32>
    %cst_16 = arith.constant dense<0.000000e+00> : vector<8x32xf32>
    %29 = tpu.matmul %27, %28, %cst_16 {dimension_numbers = #tpu.dot_dimension_numbers<[1], [0], [0], [1], [0, 0, 1, 1], [], []>} : vector<8x16xf32>, vector<16x32xf32>, vector<8x32xf32> -> vector<8x32xf32>
    %30 = vector.extract_strided_slice %8 {offsets = [0, 16], sizes = [8, 16], strides = [1, 1]} : vector<8x96xf32> to vector<8x16xf32>
    %31 = vector.extract_strided_slice %8 {offsets = [0, 48], sizes = [8, 16], strides = [1, 1]} : vector<8x96xf32> to vector<8x16xf32>
    %32 = vector.extract_strided_slice %8 {offsets = [0, 80], sizes = [8, 16], strides = [1, 1]} : vector<8x96xf32> to vector<8x16xf32>
    %cst_17 = arith.constant dense<0.000000e+00> : vector<8x8xf32>
    %33 = tpu.matmul %30, %31, %cst_17 {dimension_numbers = #tpu.dot_dimension_numbers<[1], [1], [0], [0], [0, 0, 1, 0], [], []>} : vector<8x16xf32>, vector<8x16xf32>, vector<8x8xf32> -> vector<8x8xf32>
    %cst_18 = arith.constant 2.500000e-01 : f32
    %34 = vector.broadcast %cst_18 : f32 to vector<8x8xf32>
    %35 = arith.mulf %33, %34 : vector<8x8xf32>
    %36 = vector.broadcast %3 : vector<1x8xf32> to vector<8x8xf32>
    %37 = arith.addf %35, %36 : vector<8x8xf32>
    %cst_19 = arith.constant dense<0xFF800000> : vector<8xf32>
    %38 = vector.multi_reduction <maximumf>, %37, %cst_19 [1] : vector<8x8xf32> to vector<8xf32>
    %39 = vector.shape_cast %38 : vector<8xf32> to vector<8x1xf32>
    %40 = vector.broadcast %39 : vector<8x1xf32> to vector<8x8xf32>
    %41 = arith.subf %37, %40 : vector<8x8xf32>
    %42 = math.exp %41 : vector<8x8xf32>
    %cst_20 = arith.constant dense<0.000000e+00> : vector<8xf32>
    %43 = vector.multi_reduction <add>, %42, %cst_20 [1] : vector<8x8xf32> to vector<8xf32>
    %44 = vector.shape_cast %43 : vector<8xf32> to vector<8x1xf32>
    %45 = tpu.reciprocal %44 {approx = true} : vector<8x1xf32> -> vector<8x1xf32>
    %46 = vector.broadcast %45 : vector<8x1xf32> to vector<8x8xf32>
    %47 = arith.mulf %42, %46 : vector<8x8xf32>
    %cst_21 = arith.constant dense<0.000000e+00> : vector<8x16xf32>
    %48 = tpu.matmul %47, %32, %cst_21 {dimension_numbers = #tpu.dot_dimension_numbers<[1], [0], [0], [1], [0, 0, 1, 1], [], []>} : vector<8x8xf32>, vector<8x16xf32>, vector<8x16xf32> -> vector<8x16xf32>
    %c16 = arith.constant 16 : index
    %c0_22 = arith.constant 0 : index
    %49 = vector.load %arg5[%c16, %c0_22] : memref<32x32xf32, #tpu.memory_space<vmem>>, vector<16x32xf32>
    %cst_23 = arith.constant dense<0.000000e+00> : vector<8x32xf32>
    %50 = tpu.matmul %48, %49, %cst_23 {dimension_numbers = #tpu.dot_dimension_numbers<[1], [0], [0], [1], [0, 0, 1, 1], [], []>} : vector<8x16xf32>, vector<16x32xf32>, vector<8x32xf32> -> vector<8x32xf32>
    %51 = arith.addf %29, %50 : vector<8x32xf32>
    %c0_24 = arith.constant 0 : index
    %c0_25 = arith.constant 0 : index
    %52 = vector.load %arg6[%c0_24, %c0_25] : memref<1x32xf32, #tpu.memory_space<vmem>>, vector<1x32xf32>
    %53 = vector.broadcast %52 : vector<1x32xf32> to vector<8x32xf32>
    %54 = arith.addf %51, %53 : vector<8x32xf32>
    %55 = arith.addf %54, %1 : vector<8x32xf32>
    %c0_26 = arith.constant 0 : index
    %c0_27 = arith.constant 0 : index
    %56 = vector.load %arg7[%c0_26, %c0_27] : memref<1x32xf32, #tpu.memory_space<vmem>>, vector<1x32xf32>
    %c0_28 = arith.constant 0 : index
    %c0_29 = arith.constant 0 : index
    %57 = vector.load %arg8[%c0_28, %c0_29] : memref<1x32xf32, #tpu.memory_space<vmem>>, vector<1x32xf32>
    %cst_30 = arith.constant dense<0.000000e+00> : vector<8xf32>
    %58 = vector.multi_reduction <add>, %55, %cst_30 [1] : vector<8x32xf32> to vector<8xf32>
    %59 = vector.shape_cast %58 : vector<8xf32> to vector<8x1xf32>
    %cst_31 = arith.constant 3.200000e+01 : f32
    %60 = vector.broadcast %cst_31 : f32 to vector<8x1xf32>
    %61 = arith.divf %59, %60 : vector<8x1xf32>
    %62 = vector.broadcast %61 : vector<8x1xf32> to vector<8x32xf32>
    %63 = arith.subf %55, %62 : vector<8x32xf32>
    %64 = arith.mulf %63, %63 : vector<8x32xf32>
    %cst_32 = arith.constant dense<0.000000e+00> : vector<8xf32>
    %65 = vector.multi_reduction <add>, %64, %cst_32 [1] : vector<8x32xf32> to vector<8xf32>
    %66 = vector.shape_cast %65 : vector<8xf32> to vector<8x1xf32>
    %cst_33 = arith.constant 3.200000e+01 : f32
    %67 = vector.broadcast %cst_33 : f32 to vector<8x1xf32>
    %68 = arith.divf %66, %67 : vector<8x1xf32>
    %69 = vector.broadcast %61 : vector<8x1xf32> to vector<8x32xf32>
    %70 = arith.subf %55, %69 : vector<8x32xf32>
    %cst_34 = arith.constant 9.99999996E-13 : f32
    %71 = vector.broadcast %cst_34 : f32 to vector<8x1xf32>
    %72 = arith.addf %68, %71 : vector<8x1xf32>
    %73 = math.rsqrt %72 : vector<8x1xf32>
    %74 = vector.broadcast %73 : vector<8x1xf32> to vector<8x32xf32>
    %75 = arith.mulf %70, %74 : vector<8x32xf32>
    %76 = vector.broadcast %56 : vector<1x32xf32> to vector<8x32xf32>
    %77 = arith.mulf %75, %76 : vector<8x32xf32>
    %78 = vector.broadcast %57 : vector<1x32xf32> to vector<8x32xf32>
    %79 = arith.addf %77, %78 : vector<8x32xf32>
    %c0_35 = arith.constant 0 : index
    %c0_36 = arith.constant 0 : index
    %80 = vector.load %arg9[%c0_35, %c0_36] : memref<32x64xf32, #tpu.memory_space<vmem>>, vector<32x64xf32>
    %cst_37 = arith.constant dense<0.000000e+00> : vector<8x64xf32>
    %81 = tpu.matmul %79, %80, %cst_37 {dimension_numbers = #tpu.dot_dimension_numbers<[1], [0], [0], [1], [0, 0, 1, 1], [], []>} : vector<8x32xf32>, vector<32x64xf32>, vector<8x64xf32> -> vector<8x64xf32>
    %c0_38 = arith.constant 0 : index
    %c0_39 = arith.constant 0 : index
    %82 = vector.load %arg10[%c0_38, %c0_39] : memref<1x64xf32, #tpu.memory_space<vmem>>, vector<1x64xf32>
    %83 = vector.broadcast %82 : vector<1x64xf32> to vector<8x64xf32>
    %84 = arith.addf %81, %83 : vector<8x64xf32>
    %85 = arith.mulf %84, %84 : vector<8x64xf32>
    %86 = arith.mulf %84, %85 : vector<8x64xf32>
    %cst_40 = arith.constant 4.471500e-02 : f32
    %87 = vector.broadcast %cst_40 : f32 to vector<8x64xf32>
    %88 = arith.mulf %87, %86 : vector<8x64xf32>
    %89 = arith.addf %84, %88 : vector<8x64xf32>
    %cst_41 = arith.constant 0.797884583 : f32
    %90 = vector.broadcast %cst_41 : f32 to vector<8x64xf32>
    %91 = arith.mulf %90, %89 : vector<8x64xf32>
    %92 = math.tanh %91 : vector<8x64xf32>
    %cst_42 = arith.constant 1.000000e+00 : f32
    %93 = vector.broadcast %cst_42 : f32 to vector<8x64xf32>
    %94 = arith.addf %93, %92 : vector<8x64xf32>
    %cst_43 = arith.constant 5.000000e-01 : f32
    %95 = vector.broadcast %cst_43 : f32 to vector<8x64xf32>
    %96 = arith.mulf %95, %94 : vector<8x64xf32>
    %97 = arith.mulf %84, %96 : vector<8x64xf32>
    %c0_44 = arith.constant 0 : index
    %c0_45 = arith.constant 0 : index
    %98 = vector.load %arg11[%c0_44, %c0_45] : memref<64x32xf32, #tpu.memory_space<vmem>>, vector<64x32xf32>
    %cst_46 = arith.constant dense<0.000000e+00> : vector<8x32xf32>
    %99 = tpu.matmul %97, %98, %cst_46 {dimension_numbers = #tpu.dot_dimension_numbers<[1], [0], [0], [1], [0, 0, 1, 1], [], []>} : vector<8x64xf32>, vector<64x32xf32>, vector<8x32xf32> -> vector<8x32xf32>
    %c0_47 = arith.constant 0 : index
    %c0_48 = arith.constant 0 : index
    %100 = vector.load %arg12[%c0_47, %c0_48] : memref<1x32xf32, #tpu.memory_space<vmem>>, vector<1x32xf32>
    %101 = vector.broadcast %100 : vector<1x32xf32> to vector<8x32xf32>
    %102 = arith.addf %99, %101 : vector<8x32xf32>
    %103 = arith.addf %102, %79 : vector<8x32xf32>
    %c0_49 = arith.constant 0 : index
    %c0_50 = arith.constant 0 : index
    %104 = vector.load %arg13[%c0_49, %c0_50] : memref<1x32xf32, #tpu.memory_space<vmem>>, vector<1x32xf32>
    %c0_51 = arith.constant 0 : index
    %c0_52 = arith.constant 0 : index
    %105 = vector.load %arg14[%c0_51, %c0_52] : memref<1x32xf32, #tpu.memory_space<vmem>>, vector<1x32xf32>
    %cst_53 = arith.constant dense<0.000000e+00> : vector<8xf32>
    %106 = vector.multi_reduction <add>, %103, %cst_53 [1] : vector<8x32xf32> to vector<8xf32>
    %107 = vector.shape_cast %106 : vector<8xf32> to vector<8x1xf32>
    %cst_54 = arith.constant 3.200000e+01 : f32
    %108 = vector.broadcast %cst_54 : f32 to vector<8x1xf32>
    %109 = arith.divf %107, %108 : vector<8x1xf32>
    %110 = vector.broadcast %109 : vector<8x1xf32> to vector<8x32xf32>
    %111 = arith.subf %103, %110 : vector<8x32xf32>
    %112 = arith.mulf %111, %111 : vector<8x32xf32>
    %cst_55 = arith.constant dense<0.000000e+00> : vector<8xf32>
    %113 = vector.multi_reduction <add>, %112, %cst_55 [1] : vector<8x32xf32> to vector<8xf32>
    %114 = vector.shape_cast %113 : vector<8xf32> to vector<8x1xf32>
    %cst_56 = arith.constant 3.200000e+01 : f32
    %115 = vector.broadcast %cst_56 : f32 to vector<8x1xf32>
    %116 = arith.divf %114, %115 : vector<8x1xf32>
    %117 = vector.broadcast %109 : vector<8x1xf32> to vector<8x32xf32>
    %118 = arith.subf %103, %117 : vector<8x32xf32>
    %cst_57 = arith.constant 9.99999996E-13 : f32
    %119 = vector.broadcast %cst_57 : f32 to vector<8x1xf32>
    %120 = arith.addf %116, %119 : vector<8x1xf32>
    %121 = math.rsqrt %120 : vector<8x1xf32>
    %122 = vector.broadcast %121 : vector<8x1xf32> to vector<8x32xf32>
    %123 = arith.mulf %118, %122 : vector<8x32xf32>
    %124 = vector.broadcast %104 : vector<1x32xf32> to vector<8x32xf32>
    %125 = arith.mulf %123, %124 : vector<8x32xf32>
    %126 = vector.broadcast %105 : vector<1x32xf32> to vector<8x32xf32>
    %127 = arith.addf %125, %126 : vector<8x32xf32>
    %c0_58 = arith.constant 0 : index
    %c0_59 = arith.constant 0 : index
    %c0_60 = arith.constant 0 : index
    %128 = vector.load %arg15[%c0_58, %c0_59, %c0_60] : memref<1x8x32xf32, #tpu.memory_space<vmem>>, vector<1x8x32xf32>
    %129 = vector.shape_cast %128 : vector<1x8x32xf32> to vector<8x32xf32>
    %130 = vector.shape_cast %127 : vector<8x32xf32> to vector<1x8x32xf32>
    tpu.vector_store %arg15[%c0_58, %c0_59, %c0_60], %130 {strides = array<i32>} : memref<1x8x32xf32, #tpu.memory_space<vmem>>, vector<1x8x32xf32>,
    return
  }
  func.func @transform_0(%arg0: i32) -> (i32, i32, i32) {
    %c0_i32 = arith.constant 0 : i32
    %c0_i32_0 = arith.constant 0 : i32
    %c0_i32_1 = arith.constant 0 : i32
    return %arg0, %c0_i32, %c0_i32_0 : i32, i32, i32
  }
  func.func @transform_1(%arg0: i32) -> (i32, i32, i32) {
    %c0_i32 = arith.constant 0 : i32
    %c0_i32_0 = arith.constant 0 : i32
    %c0_i32_1 = arith.constant 0 : i32
    return %arg0, %c0_i32, %c0_i32_0 : i32, i32, i32
  }
  func.func @transform_2(%arg0: i32) -> (i32, i32) {
    %c0_i32 = arith.constant 0 : i32
    %c0_i32_0 = arith.constant 0 : i32
    %c0_i32_1 = arith.constant 0 : i32
    return %c0_i32, %c0_i32_0 : i32, i32
  }
  func.func @transform_3(%arg0: i32) -> (i32, i32) {
    %c0_i32 = arith.constant 0 : i32
    %c0_i32_0 = arith.constant 0 : i32
    %c0_i32_1 = arith.constant 0 : i32
    return %c0_i32, %c0_i32_0 : i32, i32
  }
  func.func @transform_4(%arg0: i32) -> (i32, i32) {
    %c0_i32 = arith.constant 0 : i32
    %c0_i32_0 = arith.constant 0 : i32
    %c0_i32_1 = arith.constant 0 : i32
    return %c0_i32, %c0_i32_0 : i32, i32
  }
  func.func @transform_5(%arg0: i32) -> (i32, i32) {
    %c0_i32 = arith.constant 0 : i32
    %c0_i32_0 = arith.constant 0 : i32
    %c0_i32_1 = arith.constant 0 : i32
    return %c0_i32, %c0_i32_0 : i32, i32
  }
  func.func @transform_6(%arg0: i32) -> (i32, i32) {
    %c0_i32 = arith.constant 0 : i32
    %c0_i32_0 = arith.constant 0 : i32
    %c0_i32_1 = arith.constant 0 : i32
    return %c0_i32, %c0_i32_0 : i32, i32
  }
  func.func @transform_7(%arg0: i32) -> (i32, i32) {
    %c0_i32 = arith.constant 0 : i32
    %c0_i32_0 = arith.constant 0 : i32
    %c0_i32_1 = arith.constant 0 : i32
    return %c0_i32, %c0_i32_0 : i32, i32
  }
  func.func @transform_8(%arg0: i32) -> (i32, i32) {
    %c0_i32 = arith.constant 0 : i32
    %c0_i32_0 = arith.constant 0 : i32
    %c0_i32_1 = arith.constant 0 : i32
    return %c0_i32, %c0_i32_0 : i32, i32
  }
  func.func @transform_9(%arg0: i32) -> (i32, i32) {
    %c0_i32 = arith.constant 0 : i32
    %c0_i32_0 = arith.constant 0 : i32
    %c0_i32_1 = arith.constant 0 : i32
    return %c0_i32, %c0_i32_0 : i32, i32
  }
  func.func @transform_10(%arg0: i32) -> (i32, i32) {
    %c0_i32 = arith.constant 0 : i32
    %c0_i32_0 = arith.constant 0 : i32
    %c0_i32_1 = arith.constant 0 : i32
    return %c0_i32, %c0_i32_0 : i32, i32
  }
  func.func @transform_11(%arg0: i32) -> (i32, i32) {
    %c0_i32 = arith.constant 0 : i32
    %c0_i32_0 = arith.constant 0 : i32
    %c0_i32_1 = arith.constant 0 : i32
    return %c0_i32, %c0_i32_0 : i32, i32
  }
  func.func @transform_12(%arg0: i32) -> (i32, i32) {
    %c0_i32 = arith.constant 0 : i32
    %c0_i32_0 = arith.constant 0 : i32
    %c0_i32_1 = arith.constant 0 : i32
    return %c0_i32, %c0_i32_0 : i32, i32
  }
  func.func @transform_13(%arg0: i32) -> (i32, i32) {
    %c0_i32 = arith.constant 0 : i32
    %c0_i32_0 = arith.constant 0 : i32
    %c0_i32_1 = arith.constant 0 : i32
    return %c0_i32, %c0_i32_0 : i32, i32
  }
  func.func @transform_14(%arg0: i32) -> (i32, i32, i32) {
    %c0_i32 = arith.constant 0 : i32
    %c0_i32_0 = arith.constant 0 : i32
    %c0_i32_1 = arith.constant 0 : i32
    return %arg0, %c0_i32, %c0_i32_0 : i32, i32, i32
  }
}

module attributes {stable_mosaic.version = 11 : i64} {
  func.func @_pool_clf_kernel(%arg0: i32, %arg1: memref<2x32xf32, #tpu.memory_space<vmem>>, %arg2: memref<32x32xf32, #tpu.memory_space<vmem>>, %arg3: memref<1x32xf32, #tpu.memory_space<vmem>>, %arg4: memref<32x2xf32, #tpu.memory_space<vmem>>, %arg5: memref<1x2xf32, #tpu.memory_space<vmem>>, %arg6: memref<2x2xf32, #tpu.memory_space<vmem>>) attributes {dimension_semantics = [#tpu.dimension_semantics<arbitrary>], iteration_bounds = array<i64: 1>, scalar_prefetch = 0 : i64, scratch_operands = 0 : i64, tpu.core_type = #tpu.core_type<tc>, window_params = [{pipeline_mode = #tpu.pipeline_mode<synchronous>, transform_indices = @transform_0, window_bounds = array<i64: 2, 32>}, {pipeline_mode = #tpu.pipeline_mode<synchronous>, transform_indices = @transform_1, window_bounds = array<i64: 32, 32>}, {pipeline_mode = #tpu.pipeline_mode<synchronous>, transform_indices = @transform_2, window_bounds = array<i64: 1, 32>}, {pipeline_mode = #tpu.pipeline_mode<synchronous>, transform_indices = @transform_3, window_bounds = array<i64: 32, 2>}, {pipeline_mode = #tpu.pipeline_mode<synchronous>, transform_indices = @transform_4, window_bounds = array<i64: 1, 2>}, {pipeline_mode = #tpu.pipeline_mode<synchronous>, transform_indices = @transform_5, window_bounds = array<i64: 2, 2>}]} {
    %c0 = arith.constant 0 : index
    %c0_0 = arith.constant 0 : index
    %0 = vector.load %arg1[%c0, %c0_0] : memref<2x32xf32, #tpu.memory_space<vmem>>, vector<2x32xf32>
    %c0_1 = arith.constant 0 : index
    %c0_2 = arith.constant 0 : index
    %1 = vector.load %arg2[%c0_1, %c0_2] : memref<32x32xf32, #tpu.memory_space<vmem>>, vector<32x32xf32>
    %cst = arith.constant dense<0.000000e+00> : vector<2x32xf32>
    %2 = tpu.matmul %0, %1, %cst {dimension_numbers = #tpu.dot_dimension_numbers<[1], [0], [0], [1], [0, 0, 1, 1], [], []>} : vector<2x32xf32>, vector<32x32xf32>, vector<2x32xf32> -> vector<2x32xf32>
    %c0_3 = arith.constant 0 : index
    %c0_4 = arith.constant 0 : index
    %3 = vector.load %arg3[%c0_3, %c0_4] : memref<1x32xf32, #tpu.memory_space<vmem>>, vector<1x32xf32>
    %4 = vector.broadcast %3 : vector<1x32xf32> to vector<2x32xf32>
    %5 = arith.addf %2, %4 : vector<2x32xf32>
    %6 = math.tanh %5 : vector<2x32xf32>
    %c0_5 = arith.constant 0 : index
    %c0_6 = arith.constant 0 : index
    %7 = vector.load %arg4[%c0_5, %c0_6] : memref<32x2xf32, #tpu.memory_space<vmem>>, vector<32x2xf32>
    %cst_7 = arith.constant dense<0.000000e+00> : vector<2x2xf32>
    %8 = tpu.matmul %6, %7, %cst_7 {dimension_numbers = #tpu.dot_dimension_numbers<[1], [0], [0], [1], [0, 0, 1, 1], [], []>} : vector<2x32xf32>, vector<32x2xf32>, vector<2x2xf32> -> vector<2x2xf32>
    %c0_8 = arith.constant 0 : index
    %c0_9 = arith.constant 0 : index
    %9 = vector.load %arg5[%c0_8, %c0_9] : memref<1x2xf32, #tpu.memory_space<vmem>>, vector<1x2xf32>
    %10 = vector.broadcast %9 : vector<1x2xf32> to vector<2x2xf32>
    %11 = arith.addf %8, %10 : vector<2x2xf32>
    %c0_10 = arith.constant 0 : index
    %c0_11 = arith.constant 0 : index
    %12 = vector.load %arg6[%c0_10, %c0_11] : memref<2x2xf32, #tpu.memory_space<vmem>>, vector<2x2xf32>
    tpu.vector_store %arg6[%c0_10, %c0_11], %11 {strides = array<i32>} : memref<2x2xf32, #tpu.memory_space<vmem>>, vector<2x2xf32>,
    return
  }
  func.func @transform_0(%arg0: i32) -> (i32, i32) {
    %c0_i32 = arith.constant 0 : i32
    %c0_i32_0 = arith.constant 0 : i32
    %c0_i32_1 = arith.constant 0 : i32
    return %c0_i32, %c0_i32_0 : i32, i32
  }
  func.func @transform_1(%arg0: i32) -> (i32, i32) {
    %c0_i32 = arith.constant 0 : i32
    %c0_i32_0 = arith.constant 0 : i32
    %c0_i32_1 = arith.constant 0 : i32
    return %c0_i32, %c0_i32_0 : i32, i32
  }
  func.func @transform_2(%arg0: i32) -> (i32, i32) {
    %c0_i32 = arith.constant 0 : i32
    %c0_i32_0 = arith.constant 0 : i32
    %c0_i32_1 = arith.constant 0 : i32
    return %c0_i32, %c0_i32_0 : i32, i32
  }
  func.func @transform_3(%arg0: i32) -> (i32, i32) {
    %c0_i32 = arith.constant 0 : i32
    %c0_i32_0 = arith.constant 0 : i32
    %c0_i32_1 = arith.constant 0 : i32
    return %c0_i32, %c0_i32_0 : i32, i32
  }
  func.func @transform_4(%arg0: i32) -> (i32, i32) {
    %c0_i32 = arith.constant 0 : i32
    %c0_i32_0 = arith.constant 0 : i32
    %c0_i32_1 = arith.constant 0 : i32
    return %c0_i32, %c0_i32_0 : i32, i32
  }
  func.func @transform_5(%arg0: i32) -> (i32, i32) {
    %c0_i32 = arith.constant 0 : i32
    %c0_i32_0 = arith.constant 0 : i32
    %c0_i32_1 = arith.constant 0 : i32
    return %c0_i32, %c0_i32_0 : i32, i32
  }
}

</mosaic_0001>

<bundles_post_ra>
// kernel: bert4clf_forward.4
= control target key start
LH: loop header
LB: loop body
LE: loop exit
PB: predicated region body
PF: predicated region fallthrough
CT: control target
= control target key end

     0   :  { %vm18_vm0 = vcmask 261120   ;;  %s118_s0 = inlined_call_operand.vmem [shape: f32[2,8,32], index: 0, kind: input, shape index: {}]   ;;  %s119_s1 = inlined_call_operand.vmem [shape: f32[1,32], index: 1, kind: input, shape index: {}]   ;;  %s120_s2 = inlined_call_operand.vmem [shape: f32[1,32], index: 2, kind: input, shape index: {}]   ;;  %s121_s3 = inlined_call_operand.vmem [shape: f32[2,8,32], index: 3, kind: output, shape index: {}]  }
   0x1   :  { %v14_v0 = vld [vmem:[%s118_s0] sm:$0xff]  ;;  %v15_v1 = vld [vmem:[%s118_s0 + $0x8] sm:$0xff] }
   0x2   :  { %v19_v2 = vsel %vm18_vm0, %v14_v0, 0.0  ;;  %v22_v3 = vsel %vm18_vm0, %v15_v1, 0.0  ;;  %v68_v21 = vld [vmem:[%s119_s1] ss:$0 sm:$0xff] }
   0x3   :  { %20 = vadd.xlane.f32.xlu0 %v19_v2  ;;  %v69_v23 = vld [vmem:[%s120_s2] ss:$0 sm:$0xff] }
   0x7   :  { %23 = vadd.xlane.f32.xlu0 %v22_v3 }
  0x90   :  { %v21_v4 = vpop.xlane.xlu0 %20 }
  0x91   :  { %v26_v5 = vmul.f32 0.03125, %v21_v4 }
  0x93   :  { %v28_v6 = vsub.f32 %v14_v0, %v26_v5 }
  0x94   :  { %v24_v7 = vpop.xlane.xlu0 %23 }
  0x95   :  { %v27_v8 = vmul.f32 0.03125, %v24_v7  ;;  %v30_v9 = vmul.f32 %v28_v6, %v28_v6 }
  0x97   :  { %v29_v10 = vsub.f32 %v15_v1, %v27_v8  ;;  %v32_v11 = vsel %vm18_vm0, %v30_v9, 0.0 }
  0x98   :  { %33 = vadd.xlane.f32.xlu1 %v32_v11 }
  0x99   :  { %v31_v12 = vmul.f32 %v29_v10, %v29_v10 }
  0x9b   :  { %v35_v13 = vsel %vm18_vm0, %v31_v12, 0.0 }
  0x9c   :  { %36 = vadd.xlane.f32.xlu1 %v35_v13 }
 0x125   :  { %v34_v14 = vpop.xlane.xlu1 %33 }
 0x126   :  { %v38_v15 = vmul.f32 0.03125, %v34_v14 }
 0x128   :  { %v40_v16 = vadd.f32 1e-12, %v38_v15 }
 0x129   :  { %v37_v17 = vpop.xlane.xlu1 %36 }
 0x12a   :  { %70 = vrsqrt.f32 %v40_v16  ;;  %v39_v18 = vmul.f32 0.03125, %v37_v17 }
 0x12c   :  { %v41_v19 = vadd.f32 1e-12, %v39_v18 }
 0x12e   :  { %72 = vrsqrt.f32 %v41_v19 }
 0x134   :  { %v71_v20 = vpop.eup %70 }
 0x135   :  { %v44_v22 = vmul.f32 %v71_v20, %v28_v6 }
 0x137   :  { %v52_v24 = vmul.f32 %v68_v21, %v44_v22 }
 0x138   :  { %v73_v25 = vpop.eup %72 }
 0x139   :  { %v60_v26 = vadd.f32 %v69_v23, %v52_v24  ;;  %v45_v27 = vmul.f32 %v73_v25, %v29_v10 }
 0x13b   :  { %62 = vst.msk [vmem:[%s121_s3] sm:$0xff] %vm18_vm0, %v60_v26  ;;  %v53_v28 = vmul.f32 %v68_v21, %v45_v27 }
 0x13d   :  { %v61_v29 = vadd.f32 %v69_v23, %v53_v28 }
 0x13f   :  { %63 = vst.msk [vmem:[%s121_s3 + $0x8] sm:$0xff] %vm18_vm0, %v61_v29 }

// kernel: bert4clf_forward.7
= control target key start
LH: loop header
LB: loop body
LE: loop exit
PB: predicated region body
PF: predicated region fallthrough
CT: control target
= control target key end

     0   :  { %v250_v0 = vmov 0.0|0.0   ;;  %vm251_vm0 = vmmov 0   ;;  %v252_v4 = vmov 0.0   ;;  %vm32_vm1 = vcmask 261120   ;;  %s321_s1 = inlined_call_operand.vmem [shape: f32[32,32], index: 1, kind: input, shape index: {}]   ;;  %s322_s0 = inlined_call_operand.vmem [shape: f32[2,32], index: 0, kind: input, shape index: {}]   ;;  %s323_s3 = inlined_call_operand.vmem [shape: f32[32,2], index: 3, kind: input, shape index: {}]   ;;  %s324_s2 = inlined_call_operand.vmem [shape: f32[1,32], index: 2, kind: input, shape index: {}]   ;;  %s325_s4 = inlined_call_operand.vmem [shape: f32[1,2], index: 4, kind: input, shape index: {}]   ;;  %s326_s5 = inlined_call_operand.vmem [shape: f32[2,2], index: 5, kind: output, shape index: {}]  }
   0x1   :  { %233 = vmatprep.subr.bf16.mxu0 %v250_v0  ;;  %v21_v1 = vld [vmem:[%s321_s1] sm:$0xff]  ;;  %v22_v2 = vld [vmem:[%s321_s1 + $0x8] sm:$0xff]  ;;  %v23_v3 = vld [vmem:[%s321_s1 + $0x10] sm:$0xff]  ;;  %219 = vmatprep.mubr.msk.f32.mxu0 %vm251_vm0, %v252_v4  ;;  %vm191_vm2 = vcmask 9216  }
   0x2   :  { %v234_v5 = vpack.c.bf16 %v22_v2, %v21_v1  ;;  %v24_v6 = vld [vmem:[%s321_s1 + $0x18] sm:$0xff]  ;;  %239 = vmatprep.subr.bf16.mxu1 %v250_v0  ;;  %230 = vmatprep.mubr.msk.f32.mxu1 %vm251_vm0, %v252_v4  ;;  %v20_v8 = vld [vmem:[%s322_s0] sm:$0x3]  ;;  %v108_v10 = vld [vmem:[%s323_s3 + $0x8] sm:$0xff] }
   0x3   :  { %v237_v7 = vpack.c.bf16 %v24_v6, %v23_v3  ;;  %v107_v9 = vld [vmem:[%s323_s3] sm:$0xff]  ;;  %v109_v11 = vld [vmem:[%s323_s3 + $0x10] sm:$0xff]  ;;  %v110_v13 = vld [vmem:[%s323_s3 + $0x18] sm:$0xff] }
   0x4   :  { %235 = vmatpush3.bf16.msra.mxu0 %v234_v5  ;;  %v240_v12 = vpack.c.bf16 %v108_v10, %v107_v9  ;;  %v243_v14 = vpack.c.bf16 %v110_v13, %v109_v11  ;;  %v197_v15 = vld [vmem:[%s324_s2] ss:$0 sm:$0xff] }
   0x5   :  { %236 = vmatprep.subr.bf16.mxu0 %v250_v0  ;;  %v199_v20 = vld [vmem:[%s325_s4] ss:$0 sm:$0xff] }
   0x6   :  { %241 = vmatpush3.bf16.msra.mxu1 %v240_v12 }
   0x7   :  { %242 = vmatprep.subr.bf16.mxu1 %v250_v0 }
   0x8   :  { %238 = vmatpush3.bf16.msra.mxu0 %v237_v7 }
   0xa   :  { %244 = vmatpush3.bf16.msra.mxu1 %v243_v14 }
   0xb   :  { %220 = vmatmul.mubr.msk.f32.vlgmr.msra.gmra.mrb[0].mxu0 %vm32_vm1, %v20_v8 }
  0xde   :  { %v102_v16 = vpop.f32.mrb[0].mxu0 }
  0xdf   :  { %v103_v17 = vadd.f32 %v197_v15, %v102_v16  ;;  %v221_v18 = vpop.f32.mrb[1].mxu0 }
  0xe1   :  { %248 = vtanh.f32 %v103_v17 }
  0xeb   :  { %v249_v19 = vpop.eup %248 }
  0xec   :  { %231 = vmatmul.mubr.msk.f32.vlgmr.msra.gmra.mrb[0].mxu1 %vm32_vm1, %v249_v19 }
 0x1bf   :  { %v187_v21 = vpop.f32.mrb[0].mxu1 }
 0x1c0   :  { %v188_v22 = vadd.f32 %v199_v20, %v187_v21  ;;  %v232_v23 = vpop.f32.mrb[1].mxu1 }
 0x1c2   :  { %192 = vst.msk [vmem:[%s326_s5] sm:$0x3] %vm191_vm2, %v188_v22 }

// kernel: bert4clf_forward.5
= control target key start
LH: loop header
LB: loop body
LE: loop exit
PB: predicated region body
PF: predicated region fallthrough
CT: control target
= control target key end

     0   :  { %s1657_s29 = smov 0   ;;  %s1824_s0 = inlined_call_operand.vmem [shape: f32[2,8,32], index: 0, kind: input, shape index: {}]   ;;  %s1825_s1 = inlined_call_operand.vmem [shape: f32[2,1,8], index: 1, kind: input, shape index: {}]   ;;  %s1826_s2 = inlined_call_operand.vmem [shape: f32[32,96], index: 2, kind: input, shape index: {}]   ;;  %s1827_s3 = inlined_call_operand.vmem [shape: f32[1,96], index: 3, kind: input, shape index: {}]   ;;  %s1828_s4 = inlined_call_operand.vmem [shape: f32[32,32], index: 4, kind: input, shape index: {}]   ;;  %s1829_s5 = inlined_call_operand.vmem [shape: f32[1,32], index: 5, kind: input, shape index: {}]   ;;  %s1830_s6 = inlined_call_operand.vmem [shape: f32[1,32], index: 6, kind: input, shape index: {}]   ;;  %s1831_s7 = inlined_call_operand.vmem [shape: f32[1,32], index: 7, kind: input, shape index: {}]   ;;  %s1832_s8 = inlined_call_operand.vmem [shape: f32[32,64], index: 8, kind: input, shape index: {}]   ;;  %s1833_s9 = inlined_call_operand.vmem [shape: f32[1,64], index: 9, kind: input, shape index: {}]   ;;  %s1834_s10 = inlined_call_operand.vmem [shape: f32[64,32], index: 10, kind: input, shape index: {}]   ;;  %s1835_s11 = inlined_call_operand.vmem [shape: f32[1,32], index: 11, kind: input, shape index: {}]   ;;  %s1836_s12 = inlined_call_operand.vmem [shape: f32[1,32], index: 12, kind: input, shape index: {}]   ;;  %s1837_s13 = inlined_call_operand.vmem [shape: f32[1,32], index: 13, kind: input, shape index: {}]   ;;  %s1838_s14 = inlined_call_operand.vmem [shape: f32[2,8,32], index: 14, kind: output, shape index: {}]  }
   0x1 LB: > { %s1369_s30 = sadd.s32 4294967295, %s1572_s29   ;;  %p1373_p0 = scmp.ge.s32.totalorder %s1572_s29, 1  ;;  %s1572_s29 = sphi %s1657_s29, %s24_s29  }
   0x2   : > { %p419_p1 = scmp.lt.s32.totalorder %s1572_s29, 3 }
   0x4   : > { %p420_p2 = pnand %p1373_p0, %p419_p1 }
   0x5   : > { %v479_v0 = vld [vmem:[%s1826_s2] sm:$0xff] (!%p420_p2)  ;;  %v480_v1 = vld [vmem:[%s1826_s2 + $0x8] sm:$0xff] (!%p420_p2)  ;;  %v481_v2 = vld [vmem:[%s1826_s2 + $0x10] sm:$0xff] (!%p420_p2)  ;;  %v1574_v3 = vmov (!%p420_p2), 0.0|0.0   ;;  %vm1575_vm0 = vmmov (!%p420_p2), 0   ;;  %v1576_v6 = vmov (!%p420_p2), 0.0  }
   0x6   : > { %423 = sbr.rel (%p420_p2) target bundleno = 2397 (0x95d), region = 76  ;;  %1506 = vmatprep.subr.bf16.mxu0 (!%p420_p2), %v1574_v3  ;;  %v1507_v4 = vpack.c.bf16 (!%p420_p2), %v480_v1, %v479_v0  ;;  %v482_v5 = vld [vmem:[%s1826_s2 + $0x18] sm:$0xff] (!%p420_p2)  ;;  %1439 = vmatprep.mubr.msk.f32.mxu0 (!%p420_p2), %vm1575_vm0, %v1576_v6  ;;  %p466_p3 = scmp.lt.s32.totalorder (!%p420_p2), %s1369_s30, 1  ;;  %vm490_vm1 = vcmask (!%p420_p2), 261120   ;;  %v1376_v9 = vld [vmem:[%s1827_s3] ss:$0 sm:$0xff] (!%p420_p2) }
   0x7   : > { %1447 = vmatprep.subr.mxu1 (!%p420_p2), %v1576_v6  ;;  %1449 = vmatprep.mubr.msk.f32.mxu1 (!%p420_p2), %vm1575_vm0, %v1576_v6  ;;  %v1510_v7 = vpack.c.bf16 (!%p420_p2), %v482_v5, %v481_v2  ;;  %s1577_s15 = smov (!%p420_p2), 112   ;;  %s1578_s16 = smov (!%p420_p2), 96   ;;  %vm567_vm2 = vcmask (!%p420_p2), 130048   ;;  %vm650_vm3 = vcmask (!%p420_p2), 64512   ;;  %v738_v42 = vld [vmem:[%s1828_s4] sm:$0xff] (!%p420_p2)  ;;  %v739_v43 = vld [vmem:[%s1828_s4 + $0x8] sm:$0xff] (!%p420_p2) }
   0x8   : > { %1508 = vmatpush3.bf16.msra.mxu0 (!%p420_p2), %v1507_v4  ;;  %s1579_s17 = smov (!%p420_p2), 80   ;;  %s1580_s21 = smov (!%p420_p2), 48   ;;  %v1516_v46 = vpack.c.bf16 (!%p420_p2), %v739_v43, %v738_v42  ;;  %v907_v48 = vld [vmem:[%s1828_s4 + $0x10] sm:$0xff] (!%p420_p2)  ;;  %v908_v49 = vld [vmem:[%s1828_s4 + $0x18] sm:$0xff] (!%p420_p2)  ;;  %v1387_v58 = vld [vmem:[%s1829_s5] ss:$0 sm:$0xff] (!%p420_p2) }
   0x9   : > { %1509 = vmatprep.subr.bf16.mxu0 (!%p420_p2), %v1574_v3  ;;  %s1581_s22 = smov (!%p420_p2), 64   ;;  %v1513_v50 = vpack.c.bf16 (!%p420_p2), %v908_v49, %v907_v48  ;;  %vm1202_vm4 = vcmask (!%p420_p2), 523264  }
   0xc   : > { %1511 = vmatpush3.bf16.msra.mxu0 (!%p420_p2), %v1510_v7  ;;  %v1095_v7 = vld [vmem:[%s1832_s8 + $0x8] sm:$0xff] (!%p420_p2) }
   0xd   : > { %s1840_s30 = smov (!%p466_p3, %s1369_s30), 1  ;;  %1442 = vmatprep.subr.mxu0 %v1576_v6 }
   0xe   : > { %s1374_s23 = sshll.u32 %s1840_s30, 3  ;;  %s472_s20 = scalar_lea.vmem %s1825_s1, %s1840_s30 }
   0xf   : > { %s469_s26 = scalar_lea.vmem %s1824_s0, %s1374_s23  ;;  %v1380_v17 = vld [vmem:[%s472_s20] ss:$0 sm:$0xff]  ;;  %s476_s19 = scalar_lea.vmem %s1838_s14, %s1374_s23 }
  0x10   : > { %v1692_v8 = vld [vmem:[%s469_s26] sm:$0xff] }
  0x11   : > { %1440 = vmatmul.mubr.msk.f32.vlgmr.msra.gmra.mrb[0].mxu0 %vm490_vm1, %v1692_v8 }
  0x12   : > { %1444 = vmatprep.mubr.msk.f32.mxu0 %vm1575_vm0, %v1576_v6 }
  0xe4   : > { %v560_v10 = vpop.f32.mrb[0].mxu0 }
  0xe5   : > { %v561_v11 = vadd.f32 %v1376_v9, %v560_v10  ;;  %v1441_v12 = vpop.f32.mrb[1].mxu0  ;;  %v1097_v10 = vld [vmem:[%s1832_s8 + $0x18] sm:$0xff] }
  0xe7   : > { %740 = vrot.lane.b32.xlu1 %v561_v11, %s1577_s15  ;;  %565 = vrot.lane.b32.xlu0 %v561_v11, %s1578_s16 }
  0xeb   : > { %742 = vrot.lane.b32.xlu0 %v561_v11, %s1579_s17 }
 0x159   : > { %v566_v13 = vpop.permute.xlu0 %565  ;;  %v741_v15 = vpop.permute.xlu1 %740 }
 0x15a   : > { %1443 = vmatpush3.xpose.msk.msra.mxu0 %vm567_vm2, %v566_v13 }
 0x15b   : > { %1452 = vmatprep.subr.mxu0 %v1576_v6 }
 0x15d   : > { %1445 = vmatmul.mubr.msk.f32.vlgmr.msra.gmra.mrb[2].mxu0 %vm567_vm2, %v561_v11  ;;  %v743_v14 = vpop.permute.xlu0 %742 }
 0x15e   : > { %1453 = vmatpush3.xpose.msk.msra.mxu0 %vm567_vm2, %v743_v14  ;;  %1454 = vmatprep.mubr.msk.f32.mxu0 %vm1575_vm0, %v1576_v6 }
 0x15f   : > { %1512 = vmatprep.subr.bf16.mxu0 %v1574_v3 }
 0x161   : > { %1455 = vmatmul.mubr.msk.f32.vlgmr.msra.gmra.mrb[4].mxu0 %vm567_vm2, %v741_v15 }
 0x162   : > { %1466 = vmatprep.mubr.msk.f32.mxu0 %vm1575_vm0, %v1576_v6  ;;  %1514 = vmatpush3.bf16.msra.mxu0 %v1513_v50 }
 0x163   : > { %1518 = vmatprep.subr.bf16.mxu0 %v1574_v3 }
 0x230   : > { %v638_v16 = vpop.f32.mrb[2].mxu0 }
 0x231   : > { %v642_v18 = vmul.f32 0.25, %v638_v16  ;;  %v1446_v19 = vpop.f32.mrb[3].mxu0  ;;  %v1388_v16 = vld [vmem:[%s1830_s6] ss:$0 sm:$0xff] }
 0x233   : > { %v649_v20 = vadd.f32 %v1380_v17, %v642_v18  ;;  %v1389_v18 = vld [vmem:[%s1831_s7] ss:$0 sm:$0xff] }
 0x234   : > { %v814_v21 = vpop.f32.mrb[4].mxu0 }
 0x235   : > { %v818_v22 = vmul.f32 0.25, %v814_v21  ;;  %v1456_v23 = vpop.f32.mrb[5].mxu0  ;;  %v651_v24 = vsel %vm650_vm3, %v649_v20, -inf  ;;  %v1187_v21 = vld [vmem:[%s1834_s10] sm:$0xff] }
 0x236   : > { %652 = vmax.xlane.f32.xlu1 %v651_v24  ;;  %v1189_v24 = vld [vmem:[%s1834_s10 + $0x10] sm:$0xff] }
 0x237   : > { %v819_v25 = vadd.f32 %v1380_v17, %v818_v22  ;;  %v1188_v22 = vld [vmem:[%s1834_s10 + $0x8] sm:$0xff] }
 0x238   : > { %v1525_v23 = vpack.c.bf16 %v1188_v22, %v1187_v21 }
 0x239   : > { %v820_v26 = vsel %vm650_vm3, %v819_v25, -inf }
 0x23a   : > { %821 = vmax.xlane.f32.xlu0 %v820_v26 }
 0x2c3   : > { %v653_v27 = vpop.xlane.xlu1 %652 }
 0x2c4   : > { %v654_v28 = vsub.f32 %v649_v20, %v653_v27  ;;  %v1191_v27 = vld [vmem:[%s1834_s10 + $0x20] sm:$0xff] }
 0x2c6   : > { %v655_v29 = vmul.f32 1.442695, %v654_v28  ;;  %v1192_v28 = vld [vmem:[%s1834_s10 + $0x28] sm:$0xff] }
 0x2c7   : > { %v822_v30 = vpop.xlane.xlu0 %821 }
 0x2c8   : > { %1552 = vpow2.f32 %v655_v29  ;;  %v823_v31 = vsub.f32 %v819_v25, %v822_v30  ;;  %v1190_v25 = vld [vmem:[%s1834_s10 + $0x18] sm:$0xff]  ;;  %v1531_v29 = vpack.c.bf16 %v1192_v28, %v1191_v27  ;;  %v1193_v30 = vld [vmem:[%s1834_s10 + $0x30] sm:$0xff] }
 0x2c9   : > { %v1528_v26 = vpack.c.bf16 %v1190_v25, %v1189_v24 }
 0x2ca   : > { %v824_v32 = vmul.f32 1.442695, %v823_v31  ;;  %v1194_v31 = vld [vmem:[%s1834_s10 + $0x38] sm:$0xff] }
 0x2cc   : > { %1554 = vpow2.f32 %v824_v32  ;;  %v1534_v32 = vpack.c.bf16 %v1194_v31, %v1193_v30 }
 0x2d2   : > { %v1553_v33 = vpop.eup %1552 }
 0x2d3   : > { %v657_v34 = vsel %vm650_vm3, %v1553_v33, 0.0 }
 0x2d4   : > { %658 = vadd.xlane.f32.xlu0 %v657_v34 }
 0x2d6   : > { %v1555_v35 = vpop.eup %1554 }
 0x2d7   : > { %v826_v36 = vsel %vm650_vm3, %v1555_v35, 0.0 }
 0x2d8   : > { %827 = vadd.xlane.f32.xlu1 %v826_v36 }
 0x2e9   : > { %831 = vrot.lane.b32.xlu1 %v561_v11, %s1580_s21 }
 0x2ea   : > { %662 = vrot.lane.b32.xlu0 %v561_v11, %s1581_s22 }
 0x361   : > { %v659_v37 = vpop.xlane.xlu0 %658 }
 0x362   : > { %1556 = vrcp.f32 %v659_v37 }
 0x365   : > { %v828_v38 = vpop.xlane.xlu1 %827  ;;  %v663_v39 = vpop.permute.xlu0 %662 }
 0x366   : > { %1558 = vrcp.f32 %v828_v38  ;;  %1448 = vmatpush3.msra.mxu1 %v663_v39 }
 0x367   : > { %1457 = vmatprep.subr.mxu1 %v1576_v6 }
 0x369   : > { %v832_v44 = vpop.permute.xlu1 %831 }
 0x36c   : > { %v1557_v40 = vpop.eup %1556 }
 0x36d   : > { %v661_v41 = vmul.f32 %v1557_v40, %v1553_v33  ;;  %v1390_v33 = vld [vmem:[%s1833_s9] ss:$0 sm:$0xff] }
 0x36f   : > { %1450 = vmatmul.mubr.msk.f32.vlgmr.msra.gmra.mrb[0].mxu1 %vm650_vm3, %v661_v41 }
 0x370   : > { %v1559_v45 = vpop.eup %1558  ;;  %1458 = vmatpush3.msra.mxu1 %v832_v44  ;;  %1459 = vmatprep.mubr.msk.f32.mxu1 %vm1575_vm0, %v1576_v6 }
 0x371   : > { %v830_v47 = vmul.f32 %v1559_v45, %v1555_v35  ;;  %1515 = vmatprep.subr.bf16.mxu1 %v1574_v3  ;;  %v1392_v45 = vld [vmem:[%s1835_s11] ss:$0 sm:$0xff] }
 0x373   : > { %1460 = vmatmul.mubr.msk.f32.vlgmr.msra.gmra.mrb[2].mxu1 %vm650_vm3, %v830_v47 }
 0x374   : > { %1517 = vmatpush3.bf16.msra.mxu1 %v1516_v46  ;;  %1473 = vmatprep.mubr.msk.f32.mxu1 %vm1575_vm0, %v1576_v6 }
 0x375   : > { %1524 = vmatprep.subr.bf16.mxu1 %v1574_v3 }
 0x442   : > { %v734_v51 = vpop.f32.mrb[0].mxu1 }
 0x443   : > { %v1451_v52 = vpop.f32.mrb[1].mxu1  ;;  %1474 = vmatmul.mubr.msk.f32.vlgmr.msra.gmra.mrb[4].mxu1 %vm567_vm2, %v734_v51 }
 0x444   : > { %1503 = vmatprep.mubr.msk.f32.mxu1 %vm1575_vm0, %v1576_v6  ;;  %1526 = vmatpush3.bf16.msra.mxu1 %v1525_v23 }
 0x445   : > { %1527 = vmatprep.subr.bf16.mxu1 %v1574_v3 }
 0x446   : > { %v903_v53 = vpop.f32.mrb[2].mxu1 }
 0x447   : > { %v1461_v54 = vpop.f32.mrb[3].mxu1  ;;  %1467 = vmatmul.mubr.msk.f32.vlgmr.msra.gmra.mrb[6].mxu0 %vm567_vm2, %v903_v53 }
 0x448   : > { %1484 = vmatprep.mubr.msk.f32.mxu0 %vm1575_vm0, %v1576_v6  ;;  %v1094_v6 = vld [vmem:[%s1832_s8] sm:$0xff]  ;;  %1529 = vmatpush3.bf16.msra.mxu1 %v1528_v26 }
 0x449   : > { %v1519_v9 = vpack.c.bf16 %v1095_v7, %v1094_v6  ;;  %1530 = vmatprep.subr.bf16.mxu1 %v1574_v3 }
 0x44b   : > { %1520 = vmatpush3.bf16.msra.mxu0 %v1519_v9 }
 0x44c   : > { %1521 = vmatprep.subr.bf16.mxu0 %v1574_v3  ;;  %1532 = vmatpush3.bf16.msra.mxu1 %v1531_v29 }
 0x44d   : > { %1533 = vmatprep.subr.bf16.mxu1 %v1574_v3 }
 0x450   : > { %1535 = vmatpush3.bf16.msra.mxu1 %v1534_v32 }
 0x516   : > { %v1051_v55 = vpop.f32.mrb[4].mxu1 }
 0x517   : > { %v1475_v56 = vpop.f32.mrb[5].mxu1 }
 0x51a   : > { %v978_v57 = vpop.f32.mrb[6].mxu0 }
 0x51b   : > { %v1052_v59 = vadd.f32 %v1051_v55, %v978_v57  ;;  %v1468_v60 = vpop.f32.mrb[7].mxu0 }
 0x51c   : > { %v1394_v60 = vld [vmem:[%s1836_s12] ss:$0 sm:$0xff] }
 0x51d   : > { %v1062_v61 = vadd.f32 %v1387_v58, %v1052_v59 }
 0x51f   : > { %v1063_v62 = vadd.f32 %v1062_v61, %v1692_v8  ;;  %v1096_v8 = vld [vmem:[%s1832_s8 + $0x10] sm:$0xff] }
 0x520   : > { %v1522_v11 = vpack.c.bf16 %v1097_v10, %v1096_v8 }
 0x521   : > { %v1066_v63 = vsel %vm490_vm1, %v1063_v62, 0.0 }
 0x522   : > { %1067 = vadd.xlane.f32.xlu1 %v1066_v63  ;;  %1523 = vmatpush3.bf16.msra.mxu0 %v1522_v11 }
 0x5af   : > { %v1068_v0 = vpop.xlane.xlu1 %1067 }
 0x5b0   : > { %v1070_v1 = vmul.f32 0.03125, %v1068_v0 }
 0x5b2   : > { %v1071_v2 = vsub.f32 %v1063_v62, %v1070_v1  ;;  %v1395_v62 = vld [vmem:[%s1837_s13] ss:$0 sm:$0xff] }
 0x5b4   : > { %v1072_v4 = vmul.f32 %v1071_v2, %v1071_v2 }
 0x5b6   : > { %v1073_v5 = vsel %vm490_vm1, %v1072_v4, 0.0 }
 0x5b7   : > { %1074 = vadd.xlane.f32.xlu0 %v1073_v5 }
 0x644   : > { %v1075_v12 = vpop.xlane.xlu0 %1074 }
 0x645   : > { %v1076_v13 = vmul.f32 0.03125, %v1075_v12 }
 0x647   : > { %v1077_v14 = vadd.f32 1e-12, %v1076_v13 }
 0x649   : > { %1560 = vrsqrt.f32 %v1077_v14 }
 0x653   : > { %v1561_v15 = vpop.eup %1560 }
 0x654   : > { %v1079_v17 = vmul.f32 %v1561_v15, %v1071_v2 }
 0x656   : > { %v1086_v19 = vmul.f32 %v1388_v16, %v1079_v17 }
 0x658   : > { %v1093_v20 = vadd.f32 %v1389_v18, %v1086_v19 }
 0x65a   : > { %1485 = vmatmul.mubr.msk.f32.vlgmr.msra.gmra.mrb[8].mxu0 %vm490_vm1, %v1093_v20 }
 0x72d   : > { %v1174_v34 = vpop.f32.mrb[8].mxu0 }
 0x72e   : > { %v1175_v35 = vadd.f32 %v1390_v33, %v1174_v34  ;;  %v1486_v36 = vpop.f32.mrb[9].mxu0 }
 0x730   : > { %v1178_v37 = vmul.f32 %v1175_v35, %v1175_v35 }
 0x732   : > { %v1179_v38 = vmul.f32 %v1178_v37, %v1175_v35 }
 0x734   : > { %v1180_v3 = vmul.f32 0.044715, %v1179_v38 }
 0x736   : > { %v1181_v39 = vadd.f32 %v1180_v3, %v1175_v35 }
 0x738   : > { %v1182_v40 = vmul.f32 0.7978846, %v1181_v39 }
 0x73a   : > { %1562 = vtanh.f32 %v1182_v40 }
 0x744   : > { %v1563_v41 = vpop.eup %1562 }
 0x745   : > { %v1184_v42 = vadd.f32 1.0, %v1563_v41 }
 0x747   : > { %v1185_v43 = vmul.f32 0.5, %v1184_v42 }
 0x749   : > { %v1186_v44 = vmul.f32 %v1185_v43, %v1175_v35 }
 0x74b   : > { %1504 = vmatmul.mubr.msk.f32.vlgmr.msra.gmra.mrb[6].mxu1 %vm1202_vm4, %v1186_v44 }
 0x81e   : > { %v1272_v46 = vpop.f32.mrb[6].mxu1 }
 0x81f   : > { %v1273_v47 = vadd.f32 %v1392_v45, %v1272_v46  ;;  %v1505_v48 = vpop.f32.mrb[7].mxu1 }
 0x821   : > { %v1276_v49 = vadd.f32 %v1273_v47, %v1093_v20 }
 0x823   : > { %v1279_v50 = vsel %vm490_vm1, %v1276_v49, 0.0 }
 0x824   : > { %1280 = vadd.xlane.f32.xlu0 %v1279_v50 }
 0x8b1   : > { %v1281_v51 = vpop.xlane.xlu0 %1280 }
 0x8b2   : > { %v1282_v52 = vmul.f32 0.03125, %v1281_v51 }
 0x8b4   : > { %v1283_v53 = vsub.f32 %v1276_v49, %v1282_v52 }
 0x8b6   : > { %v1284_v54 = vmul.f32 %v1283_v53, %v1283_v53 }
 0x8b8   : > { %v1285_v55 = vsel %vm490_vm1, %v1284_v54, 0.0 }
 0x8b9   : > { %1286 = vadd.xlane.f32.xlu1 %v1285_v55 }
 0x946   : > { %v1287_v56 = vpop.xlane.xlu1 %1286 }
 0x947   : > { %v1288_v57 = vmul.f32 0.03125, %v1287_v56 }
 0x949   : > { %v1289_v58 = vadd.f32 1e-12, %v1288_v57 }
 0x94b   : > { %1564 = vrsqrt.f32 %v1289_v58 }
 0x955   : > { %v1565_v59 = vpop.eup %1564 }
 0x956   : > { %v1291_v61 = vmul.f32 %v1565_v59, %v1283_v53 }
 0x958   : > { %v1298_v63 = vmul.f32 %v1394_v60, %v1291_v61 }
 0x95a   : > { %v1305_v0 = vadd.f32 %v1395_v62, %v1298_v63 }
 0x95c   : > { %1306 = vst.msk [vmem:[%s476_s19] sm:$0xff] %vm490_vm1, %v1305_v0 }
 0x95d PF: > { %s24_s29 = sadd.s32 1, %s1572_s29  }
 0x95e   : > { %p21_p4 = scmp.ge.s32.totalorder %s24_s29, 4  }
 0x960   :  { %23 = sbr.rel (!%p21_p4) target bundleno = 1 (0x1), region = 109 }

</bundles_post_ra>
